<compile_context>
chip_gen: v7x
topology: tpu7x:2x2x1
jax: 0.10.0
libtpu: 0.0.40
codegen_flags: <defaults>
</compile_context>

<pallas_src>
import functools

import jax
import jax.numpy as jnp
from jax import lax
from jax.experimental import pallas as pl
from jax.experimental.pallas import tpu as pltpu


def _round_up(n, m):
    return ((n + m - 1) // m) * m


def mlp_kernel(x_ref, w1_ref, b1_ref, w2_ref, b2_ref, o_ref):
    # layer1: (Bt, In) . (Hp, In) contracted on In -> (Bt, Hp); f32 accumulation
    # on the MXU. Contracting the last dim of BOTH operands keeps the torch
    # (out_features, in_features) weight layout with no explicit transpose.
    h = lax.dot_general(
        x_ref[...], w1_ref[...],
        dimension_numbers=(((1,), (1,)), ((), ())),
        preferred_element_type=jnp.float32,
    )
    # bias + ReLU on the VPU (bias kept in f32)
    h = jnp.maximum(h + b1_ref[...], 0.0)

    # Only down-cast the f32 activations when a reduced-precision weight path
    # is in use (trace-time decision; no-op cast is never emitted for f32).
    if w2_ref.dtype != jnp.float32:
        h = h.astype(w2_ref.dtype)

    # layer2: (Bt, Hp) . (OutP, Hp) contracted on Hp -> (Bt, OutP)
    y = lax.dot_general(
        h, w2_ref[...],
        dimension_numbers=(((1,), (1,)), ((), ())),
        preferred_element_type=jnp.float32,
    )
    o_ref[...] = (y + b2_ref[...]).astype(o_ref.dtype)


def prepare_params(w1, b1, w2, b2, compute_dtype=jnp.float32):
    """One-time parameter prep, hoisted out of the forward path.

    Keeps torch (out_features, in_features) layout (no transpose needed by the
    kernel), zero-pads hidden/output feature dims up to a multiple of 128 so
    every vreg / MXU tile / output store is lane-dense, and optionally casts
    weights to bf16 (biases stay f32; accumulation is always f32).
    Padded rows/cols are zero, so they contribute nothing to the real outputs.
    """
    H, In = w1.shape
    Out, H2 = w2.shape
    assert H2 == H
    Hp = _round_up(H, 128)
    OutP = _round_up(Out, 128)

    w1p = jnp.zeros((Hp, In), compute_dtype).at[:H, :].set(w1.astype(compute_dtype))
    b1p = jnp.zeros((1, Hp), jnp.float32).at[:, :H].set(b1.astype(jnp.float32))
    w2p = jnp.zeros((OutP, Hp), compute_dtype).at[:Out, :H].set(w2.astype(compute_dtype))
    b2p = jnp.zeros((1, OutP), jnp.float32).at[:, :Out].set(b2.astype(jnp.float32))
    return w1p, b1p, w2p, b2p, Out


def mlp_forward(x, w1p, b1p, w2p, b2p, out_features, *, block_b=256):
    """x: (B, In) in any float dtype. Params from prepare_params()."""
    B, In = x.shape
    Hp, In_w = w1p.shape
    OutP, Hp_w = w2p.shape
    assert In_w == In and Hp_w == Hp

    compute_dtype = w1p.dtype
    out_dtype = x.dtype

    # Batch tiling: pad B up to a multiple of the batch tile (zeros; sliced off
    # at the end). Tile of 256 rows fills the MXU systolic rows and amortizes
    # the ~0.35 us/step grid overhead.
    bt = min(block_b, _round_up(B, 8))
    Bp = _round_up(B, bt)
    xb = x.astype(compute_dtype)
    if Bp != B:
        xb = jnp.pad(xb, ((0, Bp - B), (0, 0)))

    grid = (Bp // bt,)
    itm = jnp.dtype(compute_dtype).itemsize
    cost = pl.CostEstimate(
        flops=2 * Bp * In * Hp + 2 * Bp * Hp * OutP,
        transcendentals=0,
        bytes_accessed=(Bp * In * itm + Hp * In * itm + OutP * Hp * itm
                        + 4 * (Hp + OutP) + Bp * OutP * jnp.dtype(out_dtype).itemsize),
    )

    out = pl.pallas_call(
        mlp_kernel,
        out_shape=jax.ShapeDtypeStruct((Bp, OutP), out_dtype),
        grid=grid,
        in_specs=[
            pl.BlockSpec((bt, In), lambda i: (i, 0)),      # x: streamed per batch tile
            pl.BlockSpec((Hp, In), lambda i: (0, 0)),      # w1: VMEM-resident
            pl.BlockSpec((1, Hp), lambda i: (0, 0)),       # b1: VMEM-resident
            pl.BlockSpec((OutP, Hp), lambda i: (0, 0)),    # w2: VMEM-resident
            pl.BlockSpec((1, OutP), lambda i: (0, 0)),     # b2: VMEM-resident
        ],
        out_specs=pl.BlockSpec((bt, OutP), lambda i: (i, 0)),
        compiler_params=pltpu.CompilerParams(
            dimension_semantics=("parallel",),             # shards batch across v7x's 2 TCs
        ),
        cost_estimate=cost,
    )(xb, w1p, b1p, w2p, b2p)

    return out[:B, :out_features]


def reference_forward(x, w1, b1, w2, b2):
    h = jnp.maximum(x @ w1.T + b1, 0.0)
    return h @ w2.T + b2


if __name__ == "__main__":
    # Linear(input_size, hidden) -> ReLU -> Linear(hidden, output)
    B, input_size, hidden_size, output_size = 512, 32, 64, 16

    key = jax.random.PRNGKey(0)
    kx, kw1, kb1, kw2, kb2 = jax.random.split(key, 5)

    x = jax.random.normal(kx, (B, input_size), dtype=jnp.float32)

    # Deterministic init mimicking torch.nn.Linear's U(-1/sqrt(fan_in), +1/sqrt(fan_in))
    bound1 = 1.0 / (input_size ** 0.5)
    w1 = jax.random.uniform(kw1, (hidden_size, input_size),
                            minval=-bound1, maxval=bound1, dtype=jnp.float32)
    b1 = jax.random.uniform(kb1, (hidden_size,),
                            minval=-bound1, maxval=bound1, dtype=jnp.float32)

    bound2 = 1.0 / (hidden_size ** 0.5)
    w2 = jax.random.uniform(kw2, (output_size, hidden_size),
                            minval=-bound2, maxval=bound2, dtype=jnp.float32)
    b2 = jax.random.uniform(kb2, (output_size,),
                            minval=-bound2, maxval=bound2, dtype=jnp.float32)

    ref = reference_forward(x, w1, b1, w2, b2)

    # f32 path (bit-for-bit comparable to the PyTorch-style f32 reference)
    params_f32 = prepare_params(w1, b1, w2, b2, compute_dtype=jnp.float32)
    out = mlp_forward(x, *params_f32, block_b=256)
    out = jax.block_until_ready(out)
    assert out.shape == (B, output_size)
    assert jnp.allclose(out, ref, atol=1e-5, rtol=1e-5), "f32 mismatch vs reference"

    # bf16 weights/activations with f32 accumulation (MXU full-rate path on
    # v5e/v6e/v7x). Looser tolerance vs the f32 reference by construction.
    params_bf16 = prepare_params(w1, b1, w2, b2, compute_dtype=jnp.bfloat16)
    out_bf16 = mlp_forward(x, *params_bf16, block_b=256)
    out_bf16 = jax.block_until_ready(out_bf16)
    assert out_bf16.shape == (B, output_size)
    assert jnp.allclose(out_bf16, ref, atol=5e-2, rtol=5e-2), "bf16 mismatch vs reference"

    print("KERNEL_OK")
</pallas_src>

<mosaic_0001>
module attributes {stable_mosaic.version = 11 : i64} {
  func.func @mlp_kernel(%arg0: i32, %arg1: memref<256x32xf32, #tpu.memory_space<vmem>>, %arg2: memref<128x32xf32, #tpu.memory_space<vmem>>, %arg3: memref<1x128xf32, #tpu.memory_space<vmem>>, %arg4: memref<128x128xf32, #tpu.memory_space<vmem>>, %arg5: memref<1x128xf32, #tpu.memory_space<vmem>>, %arg6: memref<256x128xf32, #tpu.memory_space<vmem>>) attributes {dimension_semantics = [#tpu.dimension_semantics<parallel>], iteration_bounds = array<i64: 2>, scalar_prefetch = 0 : i64, scratch_operands = 0 : i64, tpu.core_type = #tpu.core_type<tc>, window_params = [{transform_indices = @transform_0, window_bounds = array<i64: 256, 32>}, {pipeline_mode = #tpu.pipeline_mode<synchronous>, transform_indices = @transform_1, window_bounds = array<i64: 128, 32>}, {pipeline_mode = #tpu.pipeline_mode<synchronous>, transform_indices = @transform_2, window_bounds = array<i64: 1, 128>}, {pipeline_mode = #tpu.pipeline_mode<synchronous>, transform_indices = @transform_3, window_bounds = array<i64: 128, 128>}, {pipeline_mode = #tpu.pipeline_mode<synchronous>, transform_indices = @transform_4, window_bounds = array<i64: 1, 128>}, {transform_indices = @transform_5, window_bounds = array<i64: 256, 128>}]} {
    %c0 = arith.constant 0 : index
    %c0_0 = arith.constant 0 : index
    %0 = vector.load %arg1[%c0, %c0_0] : memref<256x32xf32, #tpu.memory_space<vmem>>, vector<256x32xf32>
    %c0_1 = arith.constant 0 : index
    %c0_2 = arith.constant 0 : index
    %1 = vector.load %arg2[%c0_1, %c0_2] : memref<128x32xf32, #tpu.memory_space<vmem>>, vector<128x32xf32>
    %cst = arith.constant dense<0.000000e+00> : vector<256x128xf32>
    %2 = tpu.matmul %0, %1, %cst {dimension_numbers = #tpu.dot_dimension_numbers<[1], [1], [0], [0], [0, 0, 1, 0], [], []>} : vector<256x32xf32>, vector<128x32xf32>, vector<256x128xf32> -> vector<256x128xf32>
    %c0_3 = arith.constant 0 : index
    %c0_4 = arith.constant 0 : index
    %3 = vector.load %arg3[%c0_3, %c0_4] : memref<1x128xf32, #tpu.memory_space<vmem>>, vector<1x128xf32>
    %4 = vector.broadcast %3 : vector<1x128xf32> to vector<256x128xf32>
    %5 = arith.addf %2, %4 : vector<256x128xf32>
    %cst_5 = arith.constant 0.000000e+00 : f32
    %6 = vector.broadcast %cst_5 : f32 to vector<256x128xf32>
    %7 = arith.maximumf %5, %6 : vector<256x128xf32>
    %c0_6 = arith.constant 0 : index
    %c0_7 = arith.constant 0 : index
    %8 = vector.load %arg4[%c0_6, %c0_7] : memref<128x128xf32, #tpu.memory_space<vmem>>, vector<128x128xf32>
    %cst_8 = arith.constant dense<0.000000e+00> : vector<256x128xf32>
    %9 = tpu.matmul %7, %8, %cst_8 {dimension_numbers = #tpu.dot_dimension_numbers<[1], [1], [0], [0], [0, 0, 1, 0], [], []>} : vector<256x128xf32>, vector<128x128xf32>, vector<256x128xf32> -> vector<256x128xf32>
    %c0_9 = arith.constant 0 : index
    %c0_10 = arith.constant 0 : index
    %10 = vector.load %arg5[%c0_9, %c0_10] : memref<1x128xf32, #tpu.memory_space<vmem>>, vector<1x128xf32>
    %11 = vector.broadcast %10 : vector<1x128xf32> to vector<256x128xf32>
    %12 = arith.addf %9, %11 : vector<256x128xf32>
    %c0_11 = arith.constant 0 : index
    %c0_12 = arith.constant 0 : index
    %13 = vector.load %arg6[%c0_11, %c0_12] : memref<256x128xf32, #tpu.memory_space<vmem>>, vector<256x128xf32>
    tpu.vector_store %arg6[%c0_11, %c0_12], %12 {strides = array<i32>} : memref<256x128xf32, #tpu.memory_space<vmem>>, vector<256x128xf32>,
    return
  }
  func.func @transform_0(%arg0: i32) -> (i32, i32) {
    %c0_i32 = arith.constant 0 : i32
    %c0_i32_0 = arith.constant 0 : i32
    return %arg0, %c0_i32 : i32, i32
  }
  func.func @transform_1(%arg0: i32) -> (i32, i32) {
    %c0_i32 = arith.constant 0 : i32
    %c0_i32_0 = arith.constant 0 : i32
    %c0_i32_1 = arith.constant 0 : i32
    return %c0_i32, %c0_i32_0 : i32, i32
  }
  func.func @transform_2(%arg0: i32) -> (i32, i32) {
    %c0_i32 = arith.constant 0 : i32
    %c0_i32_0 = arith.constant 0 : i32
    %c0_i32_1 = arith.constant 0 : i32
    return %c0_i32, %c0_i32_0 : i32, i32
  }
  func.func @transform_3(%arg0: i32) -> (i32, i32) {
    %c0_i32 = arith.constant 0 : i32
    %c0_i32_0 = arith.constant 0 : i32
    %c0_i32_1 = arith.constant 0 : i32
    return %c0_i32, %c0_i32_0 : i32, i32
  }
  func.func @transform_4(%arg0: i32) -> (i32, i32) {
    %c0_i32 = arith.constant 0 : i32
    %c0_i32_0 = arith.constant 0 : i32
    %c0_i32_1 = arith.constant 0 : i32
    return %c0_i32, %c0_i32_0 : i32, i32
  }
  func.func @transform_5(%arg0: i32) -> (i32, i32) {
    %c0_i32 = arith.constant 0 : i32
    %c0_i32_0 = arith.constant 0 : i32
    return %arg0, %c0_i32 : i32, i32
  }
}

</mosaic_0001>

<bundles_post_ra>
// kernel: tpu_custom_call.1
= control target key start
LH: loop header
LB: loop body
LE: loop exit
PB: predicated region body
PF: predicated region fallthrough
CT: control target
= control target key end

     0   :  { %10 = vsyncpa [#allocation3], 0  ;;  %s1991_s0 = inlined_call_operand.vmem [shape: f32[512,32], index: 0, kind: input, shape index: {}]   ;;  %s1992_s1 = inlined_call_operand.vmem [shape: f32[128,32], index: 1, kind: input, shape index: {}]   ;;  %s1993_s2 = inlined_call_operand.vmem [shape: f32[1,128], index: 2, kind: input, shape index: {}]   ;;  %s1994_s3 = inlined_call_operand.vmem [shape: f32[128,128], index: 3, kind: input, shape index: {}]   ;;  %s1995_s4 = inlined_call_operand.vmem [shape: f32[1,128], index: 4, kind: input, shape index: {}]   ;;  %s1996_s5 = inlined_call_operand.hbm [shape: f32[512,128], index: 5, kind: output, shape index: {}]  }
   0x1   :  { %12 = vsyncpa [#allocation3 + $0x1], 0  ;;  %s1576_s18 = smov 0   ;;  %s1578_s19 = smov 0  }
   0x2   :  { %s1580_s20 = smov 0   ;;  %s1582_s21 = smov 0  }
   0x3 LB: > { %s1597_s22 = sadd.s32 4294967295, %s1541_s21   ;;  %s1039_s23 = sadd.s32 4294967294, %s1541_s21   ;;  %s1541_s21 = sphi %s1582_s21, %s2004_s21   ;;  %s1537_s20 = sphi %s1580_s20, %s2003_s20   ;;  %s1533_s19 = sphi %s1578_s19, %s2002_s19   ;;  %s1529_s18 = sphi %s1576_s18, %s2001_s18  }
   0x4   : > { %s1601_s24 = sadd.s32 1, %s1541_s21   ;;  %s135_s25 = sadd.s32 1, %s1537_s20 }
   0x5   : > { %s132_s26 = ssub.s32 %s1541_s21, %s1601_s24  ;;  %p145_p0 = scmp.ne.s32.totalorder %s1537_s20, %s1533_s19 }
   0x6   : > { %p133_p1 = scmp.eq.s32.totalorder %s132_s26, 0  ;;  %p146_p2 = scmp.eq.s32.totalorder %s1597_s22, 1 }
   0x7   : > { %p151_p3 = scmp.ne.s32.totalorder %s1533_s19, %s1529_s18  ;;  %p152_p4 = scmp.eq.s32.totalorder %s1039_s23, 1 }
   0x8   : > { %s1612_s27 = scalar_select %p133_p1, %s1537_s20, %s135_s25  }
   0x9   : > { %p1614_p5 = por %p146_p2, %p145_p0  ;;  %p1618_p6 = por %p152_p4, %p151_p3 }
   0xa   : > { %p1042_p7 = scmp.ge.s32.totalorder %s1541_s21, 1  ;;  %p191_p8 = scmp.lt.s32.totalorder %s1541_s21, 3 }
   0xc   : > { %p192_p9 = pnand %p1042_p7, %p191_p8 }
   0xd   : > { %v258_v0 = vld [vmem:[%s1992_s1] sm:$0xff] (!%p192_p9)  ;;  %v259_v1 = vld [vmem:[%s1992_s1 + $0x8] sm:$0xff] (!%p192_p9)  ;;  %vm281_vm0 = vcmask (!%p192_p9), 261120   ;;  %v260_v2 = vld [vmem:[%s1992_s1 + $0x10] sm:$0xff] (!%p192_p9)  ;;  %s1044_s11 = sshll.u32 (!%p192_p9), %s1597_s22, 5  ;;  %s1101_s25 = sshll.u32 (!%p192_p9), %s1597_s22, 12 }
   0xe   : > { %195 = sbr.rel (%p192_p9) target bundleno = 588 (0x24c), region = 40  ;;  %v1358_v3 = vpack.c.bf16 (!%p192_p9), %v259_v1, %v258_v0  ;;  %vm1636_vm1 = vmpackc.low (!%p192_p9), %vm281_vm0, %vm281_vm0  ;;  %v261_v5 = vld [vmem:[%s1992_s1 + $0x18] sm:$0xff] (!%p192_p9)  ;;  %p220_p10 = scmp.lt.s32.totalorder (!%p192_p9), %s1044_s11, 63  ;;  %v262_v7 = vld [vmem:[%s1992_s1 + $0x20] sm:$0xff] (!%p192_p9) }
   0xf   : > { %v1364_v6 = vpack.c.bf16 (!%p192_p9), %v261_v5, %v260_v2  ;;  %v263_v8 = vld [vmem:[%s1992_s1 + $0x28] sm:$0xff] (!%p192_p9)  ;;  %v683_v9 = vld [vmem:[%s1994_s3] sm:$0xff] (!%p192_p9)  ;;  %v685_v11 = vld [vmem:[%s1994_s3 + $0x10] sm:$0xff] (!%p192_p9)  ;;  %s1941_s8 = scalar_lea.hbm (!%p192_p9), %s1996_s5, %s1101_s25  ;;  %s1543_s10 = smov (!%p192_p9), [#allocation2]  }
  0x10   : > { %1360 = vmatprep.subr.msk.bf16.mxu0 (!%p192_p9), %vm1636_vm1, %v1358_v3  ;;  %v684_v10 = vld [vmem:[%s1994_s3 + $0x8] sm:$0xff] (!%p192_p9)  ;;  %v686_v12 = vld [vmem:[%s1994_s3 + $0x18] sm:$0xff] (!%p192_p9)  ;;  %v1370_v16 = vpack.c.bf16 (!%p192_p9), %v263_v8, %v262_v7  ;;  %v264_v17 = vld [vmem:[%s1992_s1 + $0x30] sm:$0xff] (!%p192_p9)  ;;  %s1483_s12 = sshll.u32 (!%p192_p9), %s1543_s10, 4  ;;  %s1484_s12 = int_to_ptr.vmem [resolvable:$false] %s1483_s12 }
  0x11   : > { %1363 = vmatpush3.bf16.xpose.msk.msra.mxu0 (!%p192_p9), %vm1636_vm1, %v1358_v3  ;;  %v1406_v14 = vpack.c.bf16 (!%p192_p9), %v684_v10, %v683_v9  ;;  %v1410_v15 = vpack.c.bf16 (!%p192_p9), %v686_v12, %v685_v11  ;;  %v265_v18 = vld [vmem:[%s1992_s1 + $0x38] sm:$0xff] (!%p192_p9)  ;;  %v687_v20 = vld [vmem:[%s1994_s3 + $0x20] sm:$0xff] (!%p192_p9)  ;;  %v688_v21 = vld [vmem:[%s1994_s3 + $0x28] sm:$0xff] (!%p192_p9)  ;;  %s1485_s13 = scalar_lea.vmem (!%p192_p9), %s1484_s12, 8192 }
  0x12   : > { %1366 = vmatprep.subr.msk.bf16.mxu0 (!%p192_p9), %vm1636_vm1, %v1364_v6  ;;  %v1376_v19 = vpack.c.bf16 (!%p192_p9), %v265_v18, %v264_v17  ;;  %v1414_v22 = vpack.c.bf16 (!%p192_p9), %v688_v21, %v687_v20  ;;  %v689_v23 = vld [vmem:[%s1994_s3 + $0x30] sm:$0xff] (!%p192_p9)  ;;  %v690_v24 = vld [vmem:[%s1994_s3 + $0x38] sm:$0xff] (!%p192_p9)  ;;  %v266_v25 = vld [vmem:[%s1992_s1 + $0x40] sm:$0xff] (!%p192_p9) }
  0x13   : > { %1407 = vmatprep.subr.bf16.mxu1 (!%p192_p9), %v1406_v14  ;;  %v267_v26 = vld [vmem:[%s1992_s1 + $0x48] sm:$0xff] (!%p192_p9)  ;;  %v1418_v27 = vpack.c.bf16 (!%p192_p9), %v690_v24, %v689_v23  ;;  %v691_v29 = vld [vmem:[%s1994_s3 + $0x40] sm:$0xff] (!%p192_p9)  ;;  %v268_v31 = vld [vmem:[%s1992_s1 + $0x50] sm:$0xff] (!%p192_p9) }
  0x14   : > { %1409 = vmatpush3.bf16.xpose.msra.mxu1 (!%p192_p9), %v1406_v14  ;;  %v1382_v28 = vpack.c.bf16 (!%p192_p9), %v267_v26, %v266_v25  ;;  %v692_v30 = vld [vmem:[%s1994_s3 + $0x48] sm:$0xff] (!%p192_p9)  ;;  %v269_v32 = vld [vmem:[%s1992_s1 + $0x58] sm:$0xff] (!%p192_p9)  ;;  %v693_v35 = vld [vmem:[%s1994_s3 + $0x50] sm:$0xff] (!%p192_p9) }
  0x15   : > { %s2006_s11 = smov (!%p220_p10, %s1044_s11), 63  ;;  %1411 = vmatprep.subr.bf16.mxu1 %v1410_v15  ;;  %v1422_v33 = vpack.c.bf16 %v692_v30, %v691_v29  ;;  %v1388_v34 = vpack.c.bf16 %v269_v32, %v268_v31  ;;  %v694_v36 = vld [vmem:[%s1994_s3 + $0x58] sm:$0xff]  ;;  %v270_v37 = vld [vmem:[%s1992_s1 + $0x60] sm:$0xff]  ;;  %v271_v38 = vld [vmem:[%s1992_s1 + $0x68] sm:$0xff] }
  0x16   : > { %s1045_s23 = sshll.u32 %s2006_s11, 3  ;;  %v1426_v39 = vpack.c.bf16 %v694_v36, %v693_v35  ;;  %v1394_v40 = vpack.c.bf16 %v271_v38, %v270_v37  ;;  %v695_v41 = vld [vmem:[%s1994_s3 + $0x60] sm:$0xff]  ;;  %v696_v42 = vld [vmem:[%s1994_s3 + $0x68] sm:$0xff]  ;;  %v272_v43 = vld [vmem:[%s1992_s1 + $0x70] sm:$0xff] }
  0x17   : > { %s1661_s7 = scalar_lea.vmem %s1991_s0, %s1045_s23  ;;  %v273_v44 = vld [vmem:[%s1992_s1 + $0x78] sm:$0xff]  ;;  %v1430_v45 = vpack.c.bf16 %v696_v42, %v695_v41  ;;  %v697_v47 = vld [vmem:[%s1994_s3 + $0x70] sm:$0xff]  ;;  %v1831_v17 = vld [vmem:[%s1993_s2] ss:$0 sm:$0xff] }
  0x18   : > { %v226_v13 = vld [vmem:[%s1661_s7] sm:$0xff]  ;;  %v1400_v46 = vpack.c.bf16 %v273_v44, %v272_v43  ;;  %v698_v48 = vld [vmem:[%s1994_s3 + $0x78] sm:$0xff]  ;;  %v227_v50 = vld [vmem:[%s1661_s7 + $0x8] sm:$0xff] }
  0x19   : > { %1230 = vmatprep.mubr.msk.f32.mxu0 %vm281_vm0, %v226_v13  ;;  %1369 = vmatpush3.bf16.xpose.msk.msra.mxu0 %vm1636_vm1, %v1364_v6  ;;  %v1434_v49 = vpack.c.bf16 %v698_v48, %v697_v47  ;;  %v228_v51 = vld [vmem:[%s1661_s7 + $0x10] sm:$0xff]  ;;  %v229_v52 = vld [vmem:[%s1661_s7 + $0x18] sm:$0xff]  ;;  %v230_v53 = vld [vmem:[%s1661_s7 + $0x20] sm:$0xff] }
  0x1a   : > { %1372 = vmatprep.subr.msk.bf16.mxu0 %vm1636_vm1, %v1370_v16  ;;  %v231_v54 = vld [vmem:[%s1661_s7 + $0x28] sm:$0xff]  ;;  %v232_v55 = vld [vmem:[%s1661_s7 + $0x30] sm:$0xff]  ;;  %v233_v56 = vld [vmem:[%s1661_s7 + $0x38] sm:$0xff] }
  0x1b   : > { %v234_v57 = vld [vmem:[%s1661_s7 + $0x40] sm:$0xff]  ;;  %v235_v58 = vld [vmem:[%s1661_s7 + $0x48] sm:$0xff]  ;;  %v236_v59 = vld [vmem:[%s1661_s7 + $0x50] sm:$0xff] }
  0x1c   : > { %1413 = vmatpush3.bf16.xpose.msra.mxu1 %v1410_v15  ;;  %v237_v60 = vld [vmem:[%s1661_s7 + $0x58] sm:$0xff]  ;;  %v238_v61 = vld [vmem:[%s1661_s7 + $0x60] sm:$0xff]  ;;  %v239_v62 = vld [vmem:[%s1661_s7 + $0x68] sm:$0xff] }
  0x1d   : > { %1415 = vmatprep.subr.bf16.mxu1 %v1414_v22  ;;  %v240_v63 = vld [vmem:[%s1661_s7 + $0x70] sm:$0xff]  ;;  %v241_v0 = vld [vmem:[%s1661_s7 + $0x78] sm:$0xff]  ;;  %v242_v1 = vld [vmem:[%s1661_s7 + $0x80] sm:$0xff] }
  0x1e   : > { %v243_v2 = vld [vmem:[%s1661_s7 + $0x88] sm:$0xff]  ;;  %v244_v3 = vld [vmem:[%s1661_s7 + $0x90] sm:$0xff]  ;;  %v245_v4 = vld [vmem:[%s1661_s7 + $0x98] sm:$0xff] }
  0x1f   : > { %v246_v5 = vld [vmem:[%s1661_s7 + $0xa0] sm:$0xff]  ;;  %v247_v6 = vld [vmem:[%s1661_s7 + $0xa8] sm:$0xff]  ;;  %v248_v7 = vld [vmem:[%s1661_s7 + $0xb0] sm:$0xff] }
  0x20   : > { %v249_v8 = vld [vmem:[%s1661_s7 + $0xb8] sm:$0xff]  ;;  %v250_v9 = vld [vmem:[%s1661_s7 + $0xc0] sm:$0xff]  ;;  %v251_v10 = vld [vmem:[%s1661_s7 + $0xc8] sm:$0xff] }
  0x21   : > { %1375 = vmatpush3.bf16.xpose.msk.msra.mxu0 %vm1636_vm1, %v1370_v16  ;;  %v252_v11 = vld [vmem:[%s1661_s7 + $0xd0] sm:$0xff]  ;;  %v253_v12 = vld [vmem:[%s1661_s7 + $0xd8] sm:$0xff]  ;;  %v254_v13 = vld [vmem:[%s1661_s7 + $0xe0] sm:$0xff] }
  0x22   : > { %1378 = vmatprep.subr.msk.bf16.mxu0 %vm1636_vm1, %v1376_v19  ;;  %v255_v14 = vld [vmem:[%s1661_s7 + $0xe8] sm:$0xff]  ;;  %v256_v15 = vld [vmem:[%s1661_s7 + $0xf0] sm:$0xff]  ;;  %v257_v16 = vld [vmem:[%s1661_s7 + $0xf8] sm:$0xff]  ;;  %s216_s7 = sand.u32 1, %s1533_s19  }
  0x23   : > { %s1043_s15 = sshll.u32 %s216_s7, 8  ;;  %s1950_s22 = scalar_lea.sflag [#allocation3], %s216_s7 }
  0x24   : > { %1417 = vmatpush3.bf16.xpose.msra.mxu1 %v1414_v22  ;;  %s1875_s23 = scalar_lea.vmem [#allocation2], %s1043_s15 }
  0x25   : > { %1419 = vmatprep.subr.bf16.mxu1 %v1418_v27  ;;  %s977_s26 = sshll.u32 %s1875_s23, 4  ;;  %s1943_s26 = int_to_ptr.vmem [resolvable:$true] %s977_s26 }
  0x26   : > { %s1479_s9 = scalar_lea.vmem %s1943_s26, 4096  ;;  %p1486_p0 = scmp.lt.s32.totalorder %s1943_s26, %s1484_s12 }
  0x27   : > { %p1480_p11 = scmp.ne.s32.totalorder %s1943_s26, %s1479_s9  ;;  %p1487_p1 = scmp.lt.s32.totalorder %s1485_s13, %s1479_s9 }
  0x29   : > { %1381 = vmatpush3.bf16.xpose.msk.msra.mxu0 %vm1636_vm1, %v1376_v19  ;;  %p1481_p12 = pnand %p1480_p11, %p1614_p5  ;;  %p1488_p2 = por %p1487_p1, %p1486_p0 }
  0x2a   : > { %1384 = vmatprep.subr.msk.bf16.mxu0 %vm1636_vm1, %v1382_v28 }
  0x2b   : > { %p1482_p13 = pneg %p1481_p12 }
  0x2c   : > { %1421 = vmatpush3.bf16.xpose.msra.mxu1 %v1418_v27 }
  0x2d   : > { %1423 = vmatprep.subr.bf16.mxu1 %v1422_v33  ;;  %p1489_p3 = pnand %p1488_p2, %p1482_p13 }
  0x31   : > { %1387 = vmatpush3.bf16.xpose.msk.msra.mxu0 %vm1636_vm1, %v1382_v28 }
  0x32   : > { %1390 = vmatprep.subr.msk.bf16.mxu0 %vm1636_vm1, %v1388_v34 }
  0x34   : > { %1425 = vmatpush3.bf16.xpose.msra.mxu1 %v1422_v33 }
  0x35   : > { %1427 = vmatprep.subr.bf16.mxu1 %v1426_v39 }
  0x39   : > { %1393 = vmatpush3.bf16.xpose.msk.msra.mxu0 %vm1636_vm1, %v1388_v34 }
  0x3a   : > { %1396 = vmatprep.subr.msk.bf16.mxu0 %vm1636_vm1, %v1394_v40 }
  0x3c   : > { %1429 = vmatpush3.bf16.xpose.msra.mxu1 %v1426_v39 }
  0x3d   : > { %1431 = vmatprep.subr.bf16.mxu1 %v1430_v45 }
  0x41   : > { %1399 = vmatpush3.bf16.xpose.msk.msra.mxu0 %vm1636_vm1, %v1394_v40 }
  0x42   : > { %1402 = vmatprep.subr.msk.bf16.mxu0 %vm1636_vm1, %v1400_v46 }
  0x44   : > { %1433 = vmatpush3.bf16.xpose.msra.mxu1 %v1430_v45 }
  0x45   : > { %1435 = vmatprep.subr.bf16.mxu1 %v1434_v49 }
  0x49   : > { %1405 = vmatpush3.bf16.xpose.msk.msra.mxu0 %vm1636_vm1, %v1400_v46 }
  0x4c   : > { %1437 = vmatpush3.bf16.xpose.msra.mxu1 %v1434_v49 }
  0x50   : > { %1231 = vmatmul.mubr.msk.f32.vlgmr.msra.gmra.mrb[0].mxu0 %vm281_vm0, %v227_v50 }
  0x51   : > { %1233 = vmatprep.mubr.msk.f32.mxu0 %vm281_vm0, %v228_v51 }
  0x54   : > { %1234 = vmatmul.mubr.msk.f32.gmra.mrb[2].mxu0 %vm281_vm0, %v229_v52 }
  0x55   : > { %1236 = vmatprep.mubr.msk.f32.mxu0 %vm281_vm0, %v230_v53 }
  0x58   : > { %1237 = vmatmul.mubr.msk.f32.gmra.mrb[4].mxu0 %vm281_vm0, %v231_v54 }
  0x59   : > { %1239 = vmatprep.mubr.msk.f32.mxu0 %vm281_vm0, %v232_v55 }
  0x5c   : > { %1240 = vmatmul.mubr.msk.f32.gmra.mrb[6].mxu0 %vm281_vm0, %v233_v56 }
  0x5d   : > { %1242 = vmatprep.mubr.msk.f32.mxu0 %vm281_vm0, %v234_v57 }
  0x60   : > { %1243 = vmatmul.mubr.msk.f32.gmra.mrb[8].mxu0 %vm281_vm0, %v235_v58 }
  0x61   : > { %1245 = vmatprep.mubr.msk.f32.mxu0 %vm281_vm0, %v236_v59 }
  0x64   : > { %1246 = vmatmul.mubr.msk.f32.gmra.mrb[10].mxu0 %vm281_vm0, %v237_v60 }
  0x65   : > { %1248 = vmatprep.mubr.msk.f32.mxu0 %vm281_vm0, %v238_v61 }
  0x68   : > { %1249 = vmatmul.mubr.msk.f32.gmra.mrb[12].mxu0 %vm281_vm0, %v239_v62 }
  0x69   : > { %1251 = vmatprep.mubr.msk.f32.mxu0 %vm281_vm0, %v240_v63 }
  0x6c   : > { %1252 = vmatmul.mubr.msk.f32.gmra.mrb[14].mxu0 %vm281_vm0, %v241_v0 }
  0x6d   : > { %1254 = vmatprep.mubr.msk.f32.mxu0 %vm281_vm0, %v242_v1 }
  0x70   : > { %1255 = vmatmul.mubr.msk.f32.gmra.mrb[16].mxu0 %vm281_vm0, %v243_v2 }
  0x71   : > { %1257 = vmatprep.mubr.msk.f32.mxu0 %vm281_vm0, %v244_v3 }
  0x74   : > { %1258 = vmatmul.mubr.msk.f32.gmra.mrb[18].mxu0 %vm281_vm0, %v245_v4 }
  0x75   : > { %1260 = vmatprep.mubr.msk.f32.mxu0 %vm281_vm0, %v246_v5 }
  0x78   : > { %1261 = vmatmul.mubr.msk.f32.gmra.mrb[20].mxu0 %vm281_vm0, %v247_v6 }
  0x79   : > { %1263 = vmatprep.mubr.msk.f32.mxu0 %vm281_vm0, %v248_v7 }
  0x7c   : > { %1264 = vmatmul.mubr.msk.f32.gmra.mrb[22].mxu0 %vm281_vm0, %v249_v8 }
  0x7d   : > { %1266 = vmatprep.mubr.msk.f32.mxu0 %vm281_vm0, %v250_v9 }
  0x80   : > { %1267 = vmatmul.mubr.msk.f32.gmra.mrb[24].mxu0 %vm281_vm0, %v251_v10 }
  0x81   : > { %1269 = vmatprep.mubr.msk.f32.mxu0 %vm281_vm0, %v252_v11 }
  0x84   : > { %1270 = vmatmul.mubr.msk.f32.gmra.mrb[26].mxu0 %vm281_vm0, %v253_v12 }
  0x85   : > { %1272 = vmatprep.mubr.msk.f32.mxu0 %vm281_vm0, %v254_v13 }
  0x88   : > { %1273 = vmatmul.mubr.msk.f32.gmra.mrb[28].mxu0 %vm281_vm0, %v255_v14 }
  0x89   : > { %1275 = vmatprep.mubr.msk.f32.mxu0 %vm281_vm0, %v256_v15 }
  0x8c   : > { %1276 = vmatmul.mubr.msk.f32.gmra.mrb[30].mxu0 %vm281_vm0, %v257_v16 }
 0x123   : > { %v1232_v18 = vpop.f32.mrb[0].mxu0 }
 0x124   : > { %v498_v19 = vadd.f32 %v1232_v18, %v1831_v17  ;;  %v492_v20 = vpop.f32.mrb[1].mxu0 }
 0x125   : > { %v493_v21 = vadd.f32 %v1831_v17, %v492_v20 }
 0x126   : > { %v652_v24 = vmax.f32 %v498_v19, 0.0 }
 0x127   : > { %v1235_v22 = vpop.f32.mrb[2].mxu0  ;;  %v651_v23 = vmax.f32 %v493_v21, 0.0 }
 0x128   : > { %v508_v25 = vadd.f32 %v1235_v22, %v1831_v17  ;;  %v502_v26 = vpop.f32.mrb[3].mxu0 }
 0x129   : > { %v503_v27 = vadd.f32 %v1831_v17, %v502_v26  ;;  %1310 = vmatprep.mubr.f32.mxu1 %v651_v23 }
 0x12a   : > { %1311 = vmatmul.mubr.f32.vlgmr.msra.gmra.mrb[0].mxu1 %v652_v24  ;;  %v654_v30 = vmax.f32 %v508_v25, 0.0 }
 0x12b   : > { %v653_v28 = vmax.f32 %v503_v27, 0.0  ;;  %v1238_v29 = vpop.f32.mrb[4].mxu0 }
 0x12c   : > { %v518_v31 = vadd.f32 %v1238_v29, %v1831_v17  ;;  %v512_v32 = vpop.f32.mrb[5].mxu0 }
 0x12d   : > { %v513_v33 = vadd.f32 %v1831_v17, %v512_v32  ;;  %1313 = vmatprep.mubr.f32.mxu1 %v653_v28 }
 0x12e   : > { %1314 = vmatmul.mubr.f32.gmra.mrb[2].mxu1 %v654_v30  ;;  %v656_v36 = vmax.f32 %v518_v31, 0.0 }
 0x12f   : > { %v655_v34 = vmax.f32 %v513_v33, 0.0  ;;  %v1241_v35 = vpop.f32.mrb[6].mxu0 }
 0x130   : > { %v528_v37 = vadd.f32 %v1241_v35, %v1831_v17  ;;  %v522_v38 = vpop.f32.mrb[7].mxu0 }
 0x131   : > { %v523_v39 = vadd.f32 %v1831_v17, %v522_v38  ;;  %1316 = vmatprep.mubr.f32.mxu1 %v655_v34 }
 0x132   : > { %1317 = vmatmul.mubr.f32.gmra.mrb[4].mxu1 %v656_v36  ;;  %v658_v42 = vmax.f32 %v528_v37, 0.0 }
 0x133   : > { %v657_v40 = vmax.f32 %v523_v39, 0.0  ;;  %v1244_v41 = vpop.f32.mrb[8].mxu0 }
 0x134   : > { %v538_v43 = vadd.f32 %v1244_v41, %v1831_v17  ;;  %v532_v44 = vpop.f32.mrb[9].mxu0 }
 0x135   : > { %v533_v45 = vadd.f32 %v1831_v17, %v532_v44  ;;  %1319 = vmatprep.mubr.f32.mxu1 %v657_v40 }
 0x136   : > { %1320 = vmatmul.mubr.f32.gmra.mrb[6].mxu1 %v658_v42  ;;  %v660_v48 = vmax.f32 %v538_v43, 0.0 }
 0x137   : > { %v659_v46 = vmax.f32 %v533_v45, 0.0  ;;  %v1247_v47 = vpop.f32.mrb[10].mxu0 }
 0x138   : > { %v548_v49 = vadd.f32 %v1247_v47, %v1831_v17  ;;  %v542_v50 = vpop.f32.mrb[11].mxu0 }
 0x139   : > { %v543_v51 = vadd.f32 %v1831_v17, %v542_v50  ;;  %1322 = vmatprep.mubr.f32.mxu1 %v659_v46 }
 0x13a   : > { %1323 = vmatmul.mubr.f32.gmra.mrb[8].mxu1 %v660_v48  ;;  %v662_v54 = vmax.f32 %v548_v49, 0.0 }
 0x13b   : > { %v661_v52 = vmax.f32 %v543_v51, 0.0  ;;  %v1250_v53 = vpop.f32.mrb[12].mxu0  ;;  %v1871_v51 = vld [vmem:[%s1995_s4] ss:$0 sm:$0xff] }
 0x13c   : > { %v558_v55 = vadd.f32 %v1250_v53, %v1831_v17  ;;  %v552_v56 = vpop.f32.mrb[13].mxu0 }
 0x13d   : > { %v553_v57 = vadd.f32 %v1831_v17, %v552_v56  ;;  %1325 = vmatprep.mubr.f32.mxu1 %v661_v52 }
 0x13e   : > { %1326 = vmatmul.mubr.f32.gmra.mrb[10].mxu1 %v662_v54  ;;  %v664_v60 = vmax.f32 %v558_v55, 0.0 }
 0x13f   : > { %v663_v58 = vmax.f32 %v553_v57, 0.0  ;;  %v1253_v59 = vpop.f32.mrb[14].mxu0 }
 0x140   : > { %v568_v61 = vadd.f32 %v1253_v59, %v1831_v17  ;;  %v562_v62 = vpop.f32.mrb[15].mxu0 }
 0x141   : > { %v563_v63 = vadd.f32 %v1831_v17, %v562_v62  ;;  %1328 = vmatprep.mubr.f32.mxu1 %v663_v58 }
 0x142   : > { %1329 = vmatmul.mubr.f32.gmra.mrb[12].mxu1 %v664_v60  ;;  %v666_v2 = vmax.f32 %v568_v61, 0.0 }
 0x143   : > { %v665_v0 = vmax.f32 %v563_v63, 0.0  ;;  %v1256_v1 = vpop.f32.mrb[16].mxu0 }
 0x144   : > { %v578_v3 = vadd.f32 %v1256_v1, %v1831_v17  ;;  %v572_v4 = vpop.f32.mrb[17].mxu0 }
 0x145   : > { %v573_v5 = vadd.f32 %v1831_v17, %v572_v4  ;;  %1331 = vmatprep.mubr.f32.mxu1 %v665_v0 }
 0x146   : > { %1332 = vmatmul.mubr.f32.gmra.mrb[14].mxu1 %v666_v2  ;;  %v668_v8 = vmax.f32 %v578_v3, 0.0 }
 0x147   : > { %v667_v6 = vmax.f32 %v573_v5, 0.0  ;;  %v1259_v7 = vpop.f32.mrb[18].mxu0 }
 0x148   : > { %v588_v9 = vadd.f32 %v1259_v7, %v1831_v17  ;;  %v582_v10 = vpop.f32.mrb[19].mxu0 }
 0x149   : > { %v583_v11 = vadd.f32 %v1831_v17, %v582_v10  ;;  %1334 = vmatprep.mubr.f32.mxu1 %v667_v6 }
 0x14a   : > { %1335 = vmatmul.mubr.f32.gmra.mrb[16].mxu1 %v668_v8  ;;  %v670_v14 = vmax.f32 %v588_v9, 0.0 }
 0x14b   : > { %v669_v12 = vmax.f32 %v583_v11, 0.0  ;;  %v1262_v13 = vpop.f32.mrb[20].mxu0 }
 0x14c   : > { %v598_v15 = vadd.f32 %v1262_v13, %v1831_v17  ;;  %v592_v16 = vpop.f32.mrb[21].mxu0 }
 0x14d   : > { %v593_v18 = vadd.f32 %v1831_v17, %v592_v16  ;;  %1337 = vmatprep.mubr.f32.mxu1 %v669_v12 }
 0x14e   : > { %1338 = vmatmul.mubr.f32.gmra.mrb[18].mxu1 %v670_v14  ;;  %v672_v21 = vmax.f32 %v598_v15, 0.0 }
 0x14f   : > { %v671_v19 = vmax.f32 %v593_v18, 0.0  ;;  %v1265_v20 = vpop.f32.mrb[22].mxu0 }
 0x150   : > { %v608_v22 = vadd.f32 %v1265_v20, %v1831_v17  ;;  %v602_v23 = vpop.f32.mrb[23].mxu0 }
 0x151   : > { %v603_v24 = vadd.f32 %v1831_v17, %v602_v23  ;;  %1340 = vmatprep.mubr.f32.mxu1 %v671_v19 }
 0x152   : > { %1341 = vmatmul.mubr.f32.gmra.mrb[20].mxu1 %v672_v21  ;;  %v674_v27 = vmax.f32 %v608_v22, 0.0 }
 0x153   : > { %v673_v25 = vmax.f32 %v603_v24, 0.0  ;;  %v1268_v26 = vpop.f32.mrb[24].mxu0 }
 0x154   : > { %v618_v28 = vadd.f32 %v1268_v26, %v1831_v17  ;;  %v612_v29 = vpop.f32.mrb[25].mxu0 }
 0x155   : > { %v613_v30 = vadd.f32 %v1831_v17, %v612_v29  ;;  %1343 = vmatprep.mubr.f32.mxu1 %v673_v25 }
 0x156   : > { %1344 = vmatmul.mubr.f32.gmra.mrb[22].mxu1 %v674_v27  ;;  %v676_v33 = vmax.f32 %v618_v28, 0.0 }
 0x157   : > { %v675_v31 = vmax.f32 %v613_v30, 0.0  ;;  %v1271_v32 = vpop.f32.mrb[26].mxu0 }
 0x158   : > { %v628_v34 = vadd.f32 %v1271_v32, %v1831_v17  ;;  %v622_v35 = vpop.f32.mrb[27].mxu0 }
 0x159   : > { %v623_v36 = vadd.f32 %v1831_v17, %v622_v35  ;;  %1346 = vmatprep.mubr.f32.mxu1 %v675_v31 }
 0x15a   : > { %1347 = vmatmul.mubr.f32.gmra.mrb[24].mxu1 %v676_v33  ;;  %v678_v39 = vmax.f32 %v628_v34, 0.0 }
 0x15b   : > { %v677_v37 = vmax.f32 %v623_v36, 0.0  ;;  %v1274_v38 = vpop.f32.mrb[28].mxu0 }
 0x15c   : > { %v638_v40 = vadd.f32 %v1274_v38, %v1831_v17  ;;  %v632_v41 = vpop.f32.mrb[29].mxu0 }
 0x15d   : > { %v633_v42 = vadd.f32 %v1831_v17, %v632_v41  ;;  %1349 = vmatprep.mubr.f32.mxu1 %v677_v37 }
 0x15e   : > { %1350 = vmatmul.mubr.f32.gmra.mrb[26].mxu1 %v678_v39  ;;  %v680_v45 = vmax.f32 %v638_v40, 0.0 }
 0x15f   : > { %v679_v43 = vmax.f32 %v633_v42, 0.0  ;;  %v1277_v44 = vpop.f32.mrb[30].mxu0 }
 0x160   : > { %v648_v46 = vadd.f32 %v1277_v44, %v1831_v17  ;;  %v642_v47 = vpop.f32.mrb[31].mxu0 }
 0x161   : > { %v643_v48 = vadd.f32 %v1831_v17, %v642_v47  ;;  %1352 = vmatprep.mubr.f32.mxu1 %v679_v43 }
 0x162   : > { %1353 = vmatmul.mubr.f32.gmra.mrb[28].mxu1 %v680_v45  ;;  %v682_v50 = vmax.f32 %v648_v46, 0.0 }
 0x163   : > { %v681_v49 = vmax.f32 %v643_v48, 0.0 }
 0x165   : > { %1355 = vmatprep.mubr.f32.mxu1 %v681_v49 }
 0x166   : > { %1356 = vmatmul.mubr.f32.gmra.mrb[30].mxu1 %v682_v50 }
 0x1fd   : > { %v1312_v52 = vpop.f32.mrb[0].mxu1 }
 0x1fe   : > { %v778_v53 = vadd.f32 %v1312_v52, %v1871_v51  ;;  %v772_v54 = vpop.f32.mrb[1].mxu1 }
 0x1ff   : > { %v773_v17 = vadd.f32 %v1871_v51, %v772_v54 }
 0x200   : > { %932 = vst [vmem:[%s1875_s23 + $0x8] sm:$0xff] %v778_v53 }
 0x201   : > { %931 = vst [vmem:[%s1875_s23] sm:$0xff] %v773_v17  ;;  %v1315_v55 = vpop.f32.mrb[2].mxu1 }
 0x202   : > { %v788_v56 = vadd.f32 %v1315_v55, %v1871_v51  ;;  %v782_v57 = vpop.f32.mrb[3].mxu1 }
 0x203   : > { %v783_v58 = vadd.f32 %v1871_v51, %v782_v57 }
 0x204   : > { %934 = vst [vmem:[%s1875_s23 + $0x18] sm:$0xff] %v788_v56 }
 0x205   : > { %933 = vst [vmem:[%s1875_s23 + $0x10] sm:$0xff] %v783_v58  ;;  %v1318_v59 = vpop.f32.mrb[4].mxu1 }
 0x206   : > { %v798_v60 = vadd.f32 %v1318_v59, %v1871_v51  ;;  %v792_v61 = vpop.f32.mrb[5].mxu1 }
 0x207   : > { %v793_v62 = vadd.f32 %v1871_v51, %v792_v61 }
 0x208   : > { %936 = vst [vmem:[%s1875_s23 + $0x28] sm:$0xff] %v798_v60 }
 0x209   : > { %935 = vst [vmem:[%s1875_s23 + $0x20] sm:$0xff] %v793_v62  ;;  %v1321_v63 = vpop.f32.mrb[6].mxu1 }
 0x20a   : > { %v808_v0 = vadd.f32 %v1321_v63, %v1871_v51  ;;  %v802_v1 = vpop.f32.mrb[7].mxu1 }
 0x20b   : > { %v803_v2 = vadd.f32 %v1871_v51, %v802_v1 }
 0x20c   : > { %938 = vst [vmem:[%s1875_s23 + $0x38] sm:$0xff] %v808_v0 }
 0x20d   : > { %937 = vst [vmem:[%s1875_s23 + $0x30] sm:$0xff] %v803_v2  ;;  %v1324_v3 = vpop.f32.mrb[8].mxu1 }
 0x20e   : > { %v818_v4 = vadd.f32 %v1324_v3, %v1871_v51  ;;  %v812_v5 = vpop.f32.mrb[9].mxu1 }
 0x20f   : > { %v813_v6 = vadd.f32 %v1871_v51, %v812_v5 }
 0x210   : > { %940 = vst [vmem:[%s1875_s23 + $0x48] sm:$0xff] %v818_v4 }
 0x211   : > { %939 = vst [vmem:[%s1875_s23 + $0x40] sm:$0xff] %v813_v6  ;;  %v1327_v7 = vpop.f32.mrb[10].mxu1 }
 0x212   : > { %v828_v8 = vadd.f32 %v1327_v7, %v1871_v51  ;;  %v822_v9 = vpop.f32.mrb[11].mxu1 }
 0x213   : > { %v823_v10 = vadd.f32 %v1871_v51, %v822_v9 }
 0x214   : > { %942 = vst [vmem:[%s1875_s23 + $0x58] sm:$0xff] %v828_v8 }
 0x215   : > { %941 = vst [vmem:[%s1875_s23 + $0x50] sm:$0xff] %v823_v10  ;;  %v1330_v11 = vpop.f32.mrb[12].mxu1 }
 0x216   : > { %v838_v12 = vadd.f32 %v1330_v11, %v1871_v51  ;;  %v832_v13 = vpop.f32.mrb[13].mxu1 }
 0x217   : > { %v833_v14 = vadd.f32 %v1871_v51, %v832_v13 }
 0x218   : > { %944 = vst [vmem:[%s1875_s23 + $0x68] sm:$0xff] %v838_v12 }
 0x219   : > { %943 = vst [vmem:[%s1875_s23 + $0x60] sm:$0xff] %v833_v14  ;;  %v1333_v15 = vpop.f32.mrb[14].mxu1 }
 0x21a   : > { %v848_v16 = vadd.f32 %v1333_v15, %v1871_v51  ;;  %v842_v18 = vpop.f32.mrb[15].mxu1 }
 0x21b   : > { %v843_v19 = vadd.f32 %v1871_v51, %v842_v18 }
 0x21c   : > { %946 = vst [vmem:[%s1875_s23 + $0x78] sm:$0xff] %v848_v16 }
 0x21d   : > { %945 = vst [vmem:[%s1875_s23 + $0x70] sm:$0xff] %v843_v19  ;;  %v1336_v20 = vpop.f32.mrb[16].mxu1 }
 0x21e   : > { %v858_v21 = vadd.f32 %v1336_v20, %v1871_v51  ;;  %v852_v22 = vpop.f32.mrb[17].mxu1 }
 0x21f   : > { %v853_v23 = vadd.f32 %v1871_v51, %v852_v22 }
 0x220   : > { %948 = vst [vmem:[%s1875_s23 + $0x88] sm:$0xff] %v858_v21 }
 0x221   : > { %947 = vst [vmem:[%s1875_s23 + $0x80] sm:$0xff] %v853_v23  ;;  %v1339_v24 = vpop.f32.mrb[18].mxu1 }
 0x222   : > { %v868_v25 = vadd.f32 %v1339_v24, %v1871_v51  ;;  %v862_v26 = vpop.f32.mrb[19].mxu1 }
 0x223   : > { %v863_v27 = vadd.f32 %v1871_v51, %v862_v26 }
 0x224   : > { %950 = vst [vmem:[%s1875_s23 + $0x98] sm:$0xff] %v868_v25 }
 0x225   : > { %949 = vst [vmem:[%s1875_s23 + $0x90] sm:$0xff] %v863_v27  ;;  %v1342_v28 = vpop.f32.mrb[20].mxu1 }
 0x226   : > { %v878_v29 = vadd.f32 %v1342_v28, %v1871_v51  ;;  %v872_v30 = vpop.f32.mrb[21].mxu1 }
 0x227   : > { %v873_v31 = vadd.f32 %v1871_v51, %v872_v30 }
 0x228   : > { %952 = vst [vmem:[%s1875_s23 + $0xa8] sm:$0xff] %v878_v29 }
 0x229   : > { %951 = vst [vmem:[%s1875_s23 + $0xa0] sm:$0xff] %v873_v31  ;;  %v1345_v32 = vpop.f32.mrb[22].mxu1 }
 0x22a   : > { %v888_v33 = vadd.f32 %v1345_v32, %v1871_v51  ;;  %v882_v34 = vpop.f32.mrb[23].mxu1 }
 0x22b   : > { %v883_v35 = vadd.f32 %v1871_v51, %v882_v34 }
 0x22c   : > { %954 = vst [vmem:[%s1875_s23 + $0xb8] sm:$0xff] %v888_v33 }
 0x22d   : > { %953 = vst [vmem:[%s1875_s23 + $0xb0] sm:$0xff] %v883_v35  ;;  %v1348_v36 = vpop.f32.mrb[24].mxu1 }
 0x22e   : > { %v898_v37 = vadd.f32 %v1348_v36, %v1871_v51  ;;  %v892_v38 = vpop.f32.mrb[25].mxu1 }
 0x22f   : > { %v893_v39 = vadd.f32 %v1871_v51, %v892_v38 }
 0x230   : > { %956 = vst [vmem:[%s1875_s23 + $0xc8] sm:$0xff] %v898_v37 }
 0x231   : > { %955 = vst [vmem:[%s1875_s23 + $0xc0] sm:$0xff] %v893_v39  ;;  %v1351_v40 = vpop.f32.mrb[26].mxu1 }
 0x232   : > { %v908_v41 = vadd.f32 %v1351_v40, %v1871_v51  ;;  %v902_v42 = vpop.f32.mrb[27].mxu1 }
 0x233   : > { %v903_v43 = vadd.f32 %v1871_v51, %v902_v42 }
 0x234   : > { %958 = vst [vmem:[%s1875_s23 + $0xd8] sm:$0xff] %v908_v41 }
 0x235   : > { %957 = vst [vmem:[%s1875_s23 + $0xd0] sm:$0xff] %v903_v43  ;;  %v1354_v44 = vpop.f32.mrb[28].mxu1 }
 0x236   : > { %v918_v45 = vadd.f32 %v1354_v44, %v1871_v51  ;;  %v912_v46 = vpop.f32.mrb[29].mxu1 }
 0x237   : > { %v913_v47 = vadd.f32 %v1871_v51, %v912_v46 }
 0x238   : > { %960 = vst [vmem:[%s1875_s23 + $0xe8] sm:$0xff] %v918_v45 }
 0x239   : > { %959 = vst [vmem:[%s1875_s23 + $0xe0] sm:$0xff] %v913_v47  ;;  %v1357_v48 = vpop.f32.mrb[30].mxu1 }
 0x23a   : > { %v928_v49 = vadd.f32 %v1357_v48, %v1871_v51  ;;  %v922_v50 = vpop.f32.mrb[31].mxu1 }
 0x23b   : > { %v923_v52 = vadd.f32 %v1871_v51, %v922_v50 }
 0x23c   : > { %962 = vst [vmem:[%s1875_s23 + $0xf8] sm:$0xff] %v928_v49 }
 0x23d   : > { %961 = vst [vmem:[%s1875_s23 + $0xf0] sm:$0xff] %v923_v52 }
 0x23e   : > { %1492 = shalt.err (!%p1489_p3)
}
 0x23f   : > { %s1493_s11 = scalar_lea.hbm %s1941_s8, 4096  ;;  %s1497_s15 = scalar_lea.hbm %s1996_s5, 8192 }
 0x240   : > { %p1494_p4 = scmp.ne.s32.totalorder %s1941_s8, %s1493_s11  ;;  %p1498_p9 = scmp.lt.u32.totalorder %s1941_s8, %s1996_s5 }
 0x241   : > { %p1499_p10 = scmp.lt.u32.totalorder %s1497_s15, %s1493_s11  ;;  %p1501_p12 = scmp.lt.u32.totalorder %s1493_s11, %s1941_s8 }
 0x242   : > { %p1495_p7 = pnand %p1494_p4, %p1614_p5 }
 0x243   : > { %p1500_p11 = por %p1499_p10, %p1498_p9 }
 0x244   : > { %p1496_p8 = pneg %p1495_p7 }
 0x245   : > { %p1502_p13 = por %p1501_p12, %p1500_p11 }
 0x247   : > { %p1503_p0 = pnand %p1502_p13, %p1496_p8 }
 0x249   : > { %1506 = shalt.err (!%p1503_p0)
}
 0x24a   : > { %s1544_s23 = smov 128   ;;  %s1545_s25 = smov 8  }
 0x24b   : > { %1438 = dma.vmem_to_hbm [thread:$0]  (%p1614_p5), %s1943_s26, 4096, %s1941_s8, %s1950_s22, %s1544_s23, %s1544_s23, %s1545_s25  }
 0x24c PF: > { %p1444_p1 = scmp.ge.s32.totalorder %s1541_s21, 2  ;;  %s992_s30 = sand.u32 1, %s1529_s18  }
 0x24d   : > { %s993_s6 = scalar_lea.sflag [#allocation3], %s992_s30 }
 0x24e   : > { %p1441_p2 = pnand %p1444_p1, %p1618_p6 }
 0x250   : > { %1524 = dma.done.wait (!%p1441_p2), %s993_s6, 4096  }
 0x251   : > { %1526 = vsyncadd (!%p1441_p2), %s993_s6, 4294963200  ;;  %p15_p3 = scmp.ge.s32.totalorder %s1601_s24, 4   ;;  %s2001_s18 = smov %s1533_s19 }
 0x252   : > { %s2002_s19 = smov %s1537_s20  ;;  %s2003_s20 = smov %s1612_s27 }
 0x253   : > { %s2004_s21 = smov %s1601_s24  ;;  %17 = sbr.rel (!%p15_p3) target bundleno = 3 (0x3), region = 75 }
 0x25a   :  { %998 = vsyncpa [#allocation3], 1 }
 0x25b   :  { %1000 = vsyncpa [#allocation3 + $0x1], 1 }

</bundles_post_ra>
